<compile_context>
chip_gen: v5e
topology: v5e:2x2
jax: 0.10.0
libtpu: 0.0.40
codegen_flags: <defaults>
</compile_context>

<pallas_src>
import functools

import jax
import jax.numpy as jnp
from jax.experimental import pallas as pl
from jax.experimental.pallas import tpu as pltpu

NEG_INF = -1e30
LEAKY_SLOPE = 0.01


def _gat_kernel(xr_ref, xf_ref, xt_ref, wproj_ref, wleft_ref, wright_ref,
                bias_ref, out_ref, *, num_heads, f_out):
    x_rows = xr_ref[...]        # [T, F_in]   rows handled by this grid step
    x_full = xf_ref[...]        # [N, F_in]   all nodes (neighbour side)
    x_t = xt_ref[...]           # [F_in, N]   X transposed (lane layout over j)

    # Batched projection of every node for all heads at once (lane-dense MXU):
    #   h_all[:, k*F_out:(k+1)*F_out] == X @ W_k^T
    h_all = jnp.dot(x_full, wproj_ref[...],
                    preferred_element_type=jnp.float32)          # [N, K*F_out]

    # Attention-logit pieces with `a` folded into W:
    #   s_left[r, k]  = a_k[:F] · (W_k x_r)
    #   s_right[k, j] = a_k[F:] · (W_k x_j)   (already in row-vector layout)
    s_left = jnp.dot(x_rows, wleft_ref[...],
                     preferred_element_type=jnp.float32)         # [T, K]
    s_right = jnp.dot(wright_ref[...], x_t,
                      preferred_element_type=jnp.float32)        # [K, N]

    # Head-invariant additive neighbour mask (0 for neighbours, -1e30 else),
    # converted once per row tile instead of cmp+select per head.
    bias = bias_ref[...].astype(jnp.float32)                     # [T, N]

    outs = []
    for k in range(num_heads):                                   # K is static
        e = s_left[:, k:k + 1] + s_right[k:k + 1, :]             # [T, N]
        e = jnp.maximum(e, LEAKY_SLOPE * e) + bias               # leaky + mask

        # Row-wise softmax over neighbours j.
        m = jnp.max(e, axis=1, keepdims=True)                    # [T, 1]
        p = jnp.exp(e - m)                                       # [T, N]
        denom = jnp.sum(p, axis=1, keepdims=True)                # [T, 1]
        attn = p * pl.reciprocal(denom, approx=True)             # [T, N]

        # Weighted aggregation of neighbour embeddings for head k (MXU).
        h_k = jnp.dot(attn, h_all[:, k * f_out:(k + 1) * f_out],
                      preferred_element_type=jnp.float32)        # [T, F_out]
        outs.append(jnp.where(h_k > 0.0, h_k, jnp.exp(h_k) - 1.0))   # ELU

    out_ref[...] = jnp.concatenate(outs, axis=1).astype(out_ref.dtype)


def gat_forward(X, W, a, adj, *, tile_rows=256):
    """X: [N, F_in] f32, W: [K, F_out, F_in], a: [K, 1, 2*F_out], adj: [N, N].

    Returns [N, K*F_out]: per-head ELU(attention-aggregated embedding),
    concatenated across heads -- same as the PyTorch GAT.forward.
    """
    N, f_in = X.shape
    K, f_out, _ = W.shape
    tile_rows = min(tile_rows, N)
    assert N % tile_rows == 0, "N must be divisible by tile_rows"
    assert tile_rows % 16 == 0 or tile_rows == N, "tile_rows must align to 16"

    # ---- one-time parameter / layout preprocessing (wrapper-side plumbing) --
    w_proj_t = jnp.transpose(W.reshape(K * f_out, f_in))          # [F_in, K*F_out]
    a_left = a[:, 0, :f_out]                                      # [K, F_out]
    a_right = a[:, 0, f_out:]                                     # [K, F_out]
    w_left_t = jnp.einsum("kf,kfi->ik", a_left, W)                # [F_in, K]
    w_right = jnp.einsum("kf,kfi->ki", a_right, W)                # [K, F_in]
    x_t = X.T                                                     # [F_in, N]
    # Additive neighbour mask, hoisted out of the per-head loop; bf16 halves
    # its HBM->VMEM traffic and VMEM residency vs an f32 adjacency.
    bias = jnp.where(adj != 0, 0.0, NEG_INF).astype(jnp.bfloat16)  # [N, N]

    kernel = functools.partial(_gat_kernel, num_heads=K, f_out=f_out)

    return pl.pallas_call(
        kernel,
        out_shape=jax.ShapeDtypeStruct((N, K * f_out), jnp.float32),
        grid_spec=pltpu.PrefetchScalarGridSpec(
            num_scalar_prefetch=0,
            grid=(N // tile_rows,),
            in_specs=[
                pl.BlockSpec((tile_rows, f_in), lambda i: (i, 0)),    # X row tile
                pl.BlockSpec((N, f_in), lambda i: (0, 0)),            # X (resident)
                pl.BlockSpec((f_in, N), lambda i: (0, 0)),            # X^T (resident)
                pl.BlockSpec((f_in, K * f_out), lambda i: (0, 0)),    # W_proj^T
                pl.BlockSpec((f_in, K), lambda i: (0, 0)),            # (a_l W)^T
                pl.BlockSpec((K, f_in), lambda i: (0, 0)),            # (a_r W)
                pl.BlockSpec((tile_rows, N), lambda i: (i, 0)),       # bias row tile
            ],
            out_specs=pl.BlockSpec((tile_rows, K * f_out), lambda i: (i, 0)),
        ),
        compiler_params=pltpu.CompilerParams(
            dimension_semantics=("parallel",),     # row tiles are independent
            vmem_limit_bytes=32 * 1024 * 1024,
        ),
    )(X, X, x_t, w_proj_t, w_left_t, w_right, bias)


def gat_reference(X, W, a, adj):
    """Pure-JAX dense restatement of the PyTorch per-node / per-head loops."""
    K, f_out, _ = W.shape
    outs = []
    for k in range(K):
        H = X @ W[k].T                                           # [N, F_out]
        a_l, a_r = a[k, 0, :f_out], a[k, 0, f_out:]
        e = (H @ a_l)[:, None] + (H @ a_r)[None, :]              # [N, N]
        e = jnp.where(e > 0, e, LEAKY_SLOPE * e)                 # leaky_relu
        e = jnp.where(adj > 0, e, NEG_INF)                       # neighbour mask
        attn = jax.nn.softmax(e, axis=1)
        h = attn @ H                                             # [N, F_out]
        outs.append(jax.nn.elu(h))
    return jnp.concatenate(outs, axis=1)                         # [N, K*F_out]


if __name__ == "__main__":
    # Small deterministic problem: N=64 nodes, F_in=8, F_out=8, K=4 heads,
    # 16-row tiles -> grid of 4 steps (exercises the row-tiled pipeline).
    N, F_IN, F_OUT, K = 64, 8, 8, 4
    TILE_ROWS = 16

    key = jax.random.PRNGKey(0)
    kx, kw, ka, kadj = jax.random.split(key, 4)

    X = jax.random.uniform(kx, (N, F_IN), jnp.float32)
    W = jax.random.uniform(kw, (K, F_OUT, F_IN), jnp.float32)       # torch.rand
    a = jax.random.uniform(ka, (K, 1, 2 * F_OUT), jnp.float32)      # torch.rand

    # Dense adjacency mask; add self-loops so every node has >= 1 neighbour
    # (the PyTorch code requires a non-empty neighbourhood).
    adj = (jax.random.uniform(kadj, (N, N), jnp.float32) > 0.6).astype(jnp.float32)
    adj = jnp.maximum(adj, jnp.eye(N, dtype=jnp.float32))

    out = jax.block_until_ready(gat_forward(X, W, a, adj, tile_rows=TILE_ROWS))
    ref = jax.block_until_ready(gat_reference(X, W, a, adj))

    assert out.shape == (N, K * F_OUT), out.shape
    assert jnp.allclose(out, ref, atol=3e-3, rtol=3e-3), (
        f"max abs diff {jnp.max(jnp.abs(out - ref))}"
    )
    print("KERNEL_OK")
</pallas_src>

<mosaic_0001>
module attributes {stable_mosaic.version = 11 : i64} {
  func.func @_gat_kernel(%arg0: i32, %arg1: memref<16x8xf32, #tpu.memory_space<vmem>>, %arg2: memref<64x8xf32, #tpu.memory_space<vmem>>, %arg3: memref<8x64xf32, #tpu.memory_space<vmem>>, %arg4: memref<8x32xf32, #tpu.memory_space<vmem>>, %arg5: memref<8x4xf32, #tpu.memory_space<vmem>>, %arg6: memref<4x8xf32, #tpu.memory_space<vmem>>, %arg7: memref<16x64xbf16, #tpu.memory_space<vmem>>, %arg8: memref<16x32xf32, #tpu.memory_space<vmem>>) attributes {dimension_semantics = [#tpu.dimension_semantics<parallel>], iteration_bounds = array<i64: 4>, scalar_prefetch = 0 : i64, scratch_operands = 0 : i64, tpu.core_type = #tpu.core_type<tc>, window_params = [{transform_indices = @transform_0, window_bounds = array<i64: 16, 8>}, {pipeline_mode = #tpu.pipeline_mode<synchronous>, transform_indices = @transform_1, window_bounds = array<i64: 64, 8>}, {pipeline_mode = #tpu.pipeline_mode<synchronous>, transform_indices = @transform_2, window_bounds = array<i64: 8, 64>}, {pipeline_mode = #tpu.pipeline_mode<synchronous>, transform_indices = @transform_3, window_bounds = array<i64: 8, 32>}, {pipeline_mode = #tpu.pipeline_mode<synchronous>, transform_indices = @transform_4, window_bounds = array<i64: 8, 4>}, {pipeline_mode = #tpu.pipeline_mode<synchronous>, transform_indices = @transform_5, window_bounds = array<i64: 4, 8>}, {transform_indices = @transform_6, window_bounds = array<i64: 16, 64>}, {transform_indices = @transform_7, window_bounds = array<i64: 16, 32>}]} {
    %c0 = arith.constant 0 : index
    %c0_0 = arith.constant 0 : index
    %0 = vector.load %arg1[%c0, %c0_0] : memref<16x8xf32, #tpu.memory_space<vmem>>, vector<16x8xf32>
    %c0_1 = arith.constant 0 : index
    %c0_2 = arith.constant 0 : index
    %1 = vector.load %arg2[%c0_1, %c0_2] : memref<64x8xf32, #tpu.memory_space<vmem>>, vector<64x8xf32>
    %c0_3 = arith.constant 0 : index
    %c0_4 = arith.constant 0 : index
    %2 = vector.load %arg3[%c0_3, %c0_4] : memref<8x64xf32, #tpu.memory_space<vmem>>, vector<8x64xf32>
    %c0_5 = arith.constant 0 : index
    %c0_6 = arith.constant 0 : index
    %3 = vector.load %arg4[%c0_5, %c0_6] : memref<8x32xf32, #tpu.memory_space<vmem>>, vector<8x32xf32>
    %cst = arith.constant dense<0.000000e+00> : vector<64x32xf32>
    %4 = tpu.matmul %1, %3, %cst {dimension_numbers = #tpu.dot_dimension_numbers<[1], [0], [0], [1], [0, 0, 1, 1], [], []>} : vector<64x8xf32>, vector<8x32xf32>, vector<64x32xf32> -> vector<64x32xf32>
    %c0_7 = arith.constant 0 : index
    %c0_8 = arith.constant 0 : index
    %5 = vector.load %arg5[%c0_7, %c0_8] : memref<8x4xf32, #tpu.memory_space<vmem>>, vector<8x4xf32>
    %cst_9 = arith.constant dense<0.000000e+00> : vector<16x4xf32>
    %6 = tpu.matmul %0, %5, %cst_9 {dimension_numbers = #tpu.dot_dimension_numbers<[1], [0], [0], [1], [0, 0, 1, 1], [], []>} : vector<16x8xf32>, vector<8x4xf32>, vector<16x4xf32> -> vector<16x4xf32>
    %c0_10 = arith.constant 0 : index
    %c0_11 = arith.constant 0 : index
    %7 = vector.load %arg6[%c0_10, %c0_11] : memref<4x8xf32, #tpu.memory_space<vmem>>, vector<4x8xf32>
    %cst_12 = arith.constant dense<0.000000e+00> : vector<4x64xf32>
    %8 = tpu.matmul %7, %2, %cst_12 {dimension_numbers = #tpu.dot_dimension_numbers<[1], [0], [0], [1], [0, 0, 1, 1], [], []>} : vector<4x8xf32>, vector<8x64xf32>, vector<4x64xf32> -> vector<4x64xf32>
    %c0_13 = arith.constant 0 : index
    %c0_14 = arith.constant 0 : index
    %9 = vector.load %arg7[%c0_13, %c0_14] : memref<16x64xbf16, #tpu.memory_space<vmem>>, vector<16x64xbf16>
    %10 = arith.extf %9 : vector<16x64xbf16> to vector<16x64xf32>
    %11 = vector.extract_strided_slice %6 {offsets = [0, 0], sizes = [16, 1], strides = [1, 1]} : vector<16x4xf32> to vector<16x1xf32>
    %12 = vector.extract_strided_slice %8 {offsets = [0, 0], sizes = [1, 64], strides = [1, 1]} : vector<4x64xf32> to vector<1x64xf32>
    %13 = vector.broadcast %11 : vector<16x1xf32> to vector<16x64xf32>
    %14 = vector.broadcast %12 : vector<1x64xf32> to vector<16x64xf32>
    %15 = arith.addf %13, %14 : vector<16x64xf32>
    %cst_15 = arith.constant 0.00999999977 : f32
    %16 = vector.broadcast %cst_15 : f32 to vector<16x64xf32>
    %17 = arith.mulf %16, %15 : vector<16x64xf32>
    %18 = arith.maximumf %15, %17 : vector<16x64xf32>
    %19 = arith.addf %18, %10 : vector<16x64xf32>
    %cst_16 = arith.constant dense<0xFF800000> : vector<16xf32>
    %20 = vector.multi_reduction <maximumf>, %19, %cst_16 [1] : vector<16x64xf32> to vector<16xf32>
    %21 = vector.shape_cast %20 : vector<16xf32> to vector<16x1xf32>
    %22 = vector.broadcast %21 : vector<16x1xf32> to vector<16x64xf32>
    %23 = arith.subf %19, %22 : vector<16x64xf32>
    %24 = math.exp %23 : vector<16x64xf32>
    %cst_17 = arith.constant dense<0.000000e+00> : vector<16xf32>
    %25 = vector.multi_reduction <add>, %24, %cst_17 [1] : vector<16x64xf32> to vector<16xf32>
    %26 = vector.shape_cast %25 : vector<16xf32> to vector<16x1xf32>
    %27 = tpu.reciprocal %26 {approx = true} : vector<16x1xf32> -> vector<16x1xf32>
    %28 = vector.broadcast %27 : vector<16x1xf32> to vector<16x64xf32>
    %29 = arith.mulf %24, %28 : vector<16x64xf32>
    %30 = vector.extract_strided_slice %4 {offsets = [0, 0], sizes = [64, 8], strides = [1, 1]} : vector<64x32xf32> to vector<64x8xf32>
    %cst_18 = arith.constant dense<0.000000e+00> : vector<16x8xf32>
    %31 = tpu.matmul %29, %30, %cst_18 {dimension_numbers = #tpu.dot_dimension_numbers<[1], [0], [0], [1], [0, 0, 1, 1], [], []>} : vector<16x64xf32>, vector<64x8xf32>, vector<16x8xf32> -> vector<16x8xf32>
    %cst_19 = arith.constant 0.000000e+00 : f32
    %32 = vector.broadcast %cst_19 : f32 to vector<16x8xf32>
    %33 = arith.cmpf ogt, %31, %32 : vector<16x8xf32>
    %34 = math.exp %31 : vector<16x8xf32>
    %cst_20 = arith.constant 1.000000e+00 : f32
    %35 = vector.broadcast %cst_20 : f32 to vector<16x8xf32>
    %36 = arith.subf %34, %35 : vector<16x8xf32>
    %37 = arith.select %33, %31, %36 : vector<16x8xi1>, vector<16x8xf32>
    %38 = vector.extract_strided_slice %6 {offsets = [0, 1], sizes = [16, 1], strides = [1, 1]} : vector<16x4xf32> to vector<16x1xf32>
    %39 = vector.extract_strided_slice %8 {offsets = [1, 0], sizes = [1, 64], strides = [1, 1]} : vector<4x64xf32> to vector<1x64xf32>
    %40 = vector.broadcast %38 : vector<16x1xf32> to vector<16x64xf32>
    %41 = vector.broadcast %39 : vector<1x64xf32> to vector<16x64xf32>
    %42 = arith.addf %40, %41 : vector<16x64xf32>
    %cst_21 = arith.constant 0.00999999977 : f32
    %43 = vector.broadcast %cst_21 : f32 to vector<16x64xf32>
    %44 = arith.mulf %43, %42 : vector<16x64xf32>
    %45 = arith.maximumf %42, %44 : vector<16x64xf32>
    %46 = arith.addf %45, %10 : vector<16x64xf32>
    %cst_22 = arith.constant dense<0xFF800000> : vector<16xf32>
    %47 = vector.multi_reduction <maximumf>, %46, %cst_22 [1] : vector<16x64xf32> to vector<16xf32>
    %48 = vector.shape_cast %47 : vector<16xf32> to vector<16x1xf32>
    %49 = vector.broadcast %48 : vector<16x1xf32> to vector<16x64xf32>
    %50 = arith.subf %46, %49 : vector<16x64xf32>
    %51 = math.exp %50 : vector<16x64xf32>
    %cst_23 = arith.constant dense<0.000000e+00> : vector<16xf32>
    %52 = vector.multi_reduction <add>, %51, %cst_23 [1] : vector<16x64xf32> to vector<16xf32>
    %53 = vector.shape_cast %52 : vector<16xf32> to vector<16x1xf32>
    %54 = tpu.reciprocal %53 {approx = true} : vector<16x1xf32> -> vector<16x1xf32>
    %55 = vector.broadcast %54 : vector<16x1xf32> to vector<16x64xf32>
    %56 = arith.mulf %51, %55 : vector<16x64xf32>
    %57 = vector.extract_strided_slice %4 {offsets = [0, 8], sizes = [64, 8], strides = [1, 1]} : vector<64x32xf32> to vector<64x8xf32>
    %cst_24 = arith.constant dense<0.000000e+00> : vector<16x8xf32>
    %58 = tpu.matmul %56, %57, %cst_24 {dimension_numbers = #tpu.dot_dimension_numbers<[1], [0], [0], [1], [0, 0, 1, 1], [], []>} : vector<16x64xf32>, vector<64x8xf32>, vector<16x8xf32> -> vector<16x8xf32>
    %cst_25 = arith.constant 0.000000e+00 : f32
    %59 = vector.broadcast %cst_25 : f32 to vector<16x8xf32>
    %60 = arith.cmpf ogt, %58, %59 : vector<16x8xf32>
    %61 = math.exp %58 : vector<16x8xf32>
    %cst_26 = arith.constant 1.000000e+00 : f32
    %62 = vector.broadcast %cst_26 : f32 to vector<16x8xf32>
    %63 = arith.subf %61, %62 : vector<16x8xf32>
    %64 = arith.select %60, %58, %63 : vector<16x8xi1>, vector<16x8xf32>
    %65 = vector.extract_strided_slice %6 {offsets = [0, 2], sizes = [16, 1], strides = [1, 1]} : vector<16x4xf32> to vector<16x1xf32>
    %66 = vector.extract_strided_slice %8 {offsets = [2, 0], sizes = [1, 64], strides = [1, 1]} : vector<4x64xf32> to vector<1x64xf32>
    %67 = vector.broadcast %65 : vector<16x1xf32> to vector<16x64xf32>
    %68 = vector.broadcast %66 : vector<1x64xf32> to vector<16x64xf32>
    %69 = arith.addf %67, %68 : vector<16x64xf32>
    %cst_27 = arith.constant 0.00999999977 : f32
    %70 = vector.broadcast %cst_27 : f32 to vector<16x64xf32>
    %71 = arith.mulf %70, %69 : vector<16x64xf32>
    %72 = arith.maximumf %69, %71 : vector<16x64xf32>
    %73 = arith.addf %72, %10 : vector<16x64xf32>
    %cst_28 = arith.constant dense<0xFF800000> : vector<16xf32>
    %74 = vector.multi_reduction <maximumf>, %73, %cst_28 [1] : vector<16x64xf32> to vector<16xf32>
    %75 = vector.shape_cast %74 : vector<16xf32> to vector<16x1xf32>
    %76 = vector.broadcast %75 : vector<16x1xf32> to vector<16x64xf32>
    %77 = arith.subf %73, %76 : vector<16x64xf32>
    %78 = math.exp %77 : vector<16x64xf32>
    %cst_29 = arith.constant dense<0.000000e+00> : vector<16xf32>
    %79 = vector.multi_reduction <add>, %78, %cst_29 [1] : vector<16x64xf32> to vector<16xf32>
    %80 = vector.shape_cast %79 : vector<16xf32> to vector<16x1xf32>
    %81 = tpu.reciprocal %80 {approx = true} : vector<16x1xf32> -> vector<16x1xf32>
    %82 = vector.broadcast %81 : vector<16x1xf32> to vector<16x64xf32>
    %83 = arith.mulf %78, %82 : vector<16x64xf32>
    %84 = vector.extract_strided_slice %4 {offsets = [0, 16], sizes = [64, 8], strides = [1, 1]} : vector<64x32xf32> to vector<64x8xf32>
    %cst_30 = arith.constant dense<0.000000e+00> : vector<16x8xf32>
    %85 = tpu.matmul %83, %84, %cst_30 {dimension_numbers = #tpu.dot_dimension_numbers<[1], [0], [0], [1], [0, 0, 1, 1], [], []>} : vector<16x64xf32>, vector<64x8xf32>, vector<16x8xf32> -> vector<16x8xf32>
    %cst_31 = arith.constant 0.000000e+00 : f32
    %86 = vector.broadcast %cst_31 : f32 to vector<16x8xf32>
    %87 = arith.cmpf ogt, %85, %86 : vector<16x8xf32>
    %88 = math.exp %85 : vector<16x8xf32>
    %cst_32 = arith.constant 1.000000e+00 : f32
    %89 = vector.broadcast %cst_32 : f32 to vector<16x8xf32>
    %90 = arith.subf %88, %89 : vector<16x8xf32>
    %91 = arith.select %87, %85, %90 : vector<16x8xi1>, vector<16x8xf32>
    %92 = vector.extract_strided_slice %6 {offsets = [0, 3], sizes = [16, 1], strides = [1, 1]} : vector<16x4xf32> to vector<16x1xf32>
    %93 = vector.extract_strided_slice %8 {offsets = [3, 0], sizes = [1, 64], strides = [1, 1]} : vector<4x64xf32> to vector<1x64xf32>
    %94 = vector.broadcast %92 : vector<16x1xf32> to vector<16x64xf32>
    %95 = vector.broadcast %93 : vector<1x64xf32> to vector<16x64xf32>
    %96 = arith.addf %94, %95 : vector<16x64xf32>
    %cst_33 = arith.constant 0.00999999977 : f32
    %97 = vector.broadcast %cst_33 : f32 to vector<16x64xf32>
    %98 = arith.mulf %97, %96 : vector<16x64xf32>
    %99 = arith.maximumf %96, %98 : vector<16x64xf32>
    %100 = arith.addf %99, %10 : vector<16x64xf32>
    %cst_34 = arith.constant dense<0xFF800000> : vector<16xf32>
    %101 = vector.multi_reduction <maximumf>, %100, %cst_34 [1] : vector<16x64xf32> to vector<16xf32>
    %102 = vector.shape_cast %101 : vector<16xf32> to vector<16x1xf32>
    %103 = vector.broadcast %102 : vector<16x1xf32> to vector<16x64xf32>
    %104 = arith.subf %100, %103 : vector<16x64xf32>
    %105 = math.exp %104 : vector<16x64xf32>
    %cst_35 = arith.constant dense<0.000000e+00> : vector<16xf32>
    %106 = vector.multi_reduction <add>, %105, %cst_35 [1] : vector<16x64xf32> to vector<16xf32>
    %107 = vector.shape_cast %106 : vector<16xf32> to vector<16x1xf32>
    %108 = tpu.reciprocal %107 {approx = true} : vector<16x1xf32> -> vector<16x1xf32>
    %109 = vector.broadcast %108 : vector<16x1xf32> to vector<16x64xf32>
    %110 = arith.mulf %105, %109 : vector<16x64xf32>
    %111 = vector.extract_strided_slice %4 {offsets = [0, 24], sizes = [64, 8], strides = [1, 1]} : vector<64x32xf32> to vector<64x8xf32>
    %cst_36 = arith.constant dense<0.000000e+00> : vector<16x8xf32>
    %112 = tpu.matmul %110, %111, %cst_36 {dimension_numbers = #tpu.dot_dimension_numbers<[1], [0], [0], [1], [0, 0, 1, 1], [], []>} : vector<16x64xf32>, vector<64x8xf32>, vector<16x8xf32> -> vector<16x8xf32>
    %cst_37 = arith.constant 0.000000e+00 : f32
    %113 = vector.broadcast %cst_37 : f32 to vector<16x8xf32>
    %114 = arith.cmpf ogt, %112, %113 : vector<16x8xf32>
    %115 = math.exp %112 : vector<16x8xf32>
    %cst_38 = arith.constant 1.000000e+00 : f32
    %116 = vector.broadcast %cst_38 : f32 to vector<16x8xf32>
    %117 = arith.subf %115, %116 : vector<16x8xf32>
    %118 = arith.select %114, %112, %117 : vector<16x8xi1>, vector<16x8xf32>
    %119 = tpu.concatenate %37, %64, %91, %118 in 1 : vector<16x8xf32>, vector<16x8xf32>, vector<16x8xf32>, vector<16x8xf32> -> vector<16x32xf32>
    %c0_39 = arith.constant 0 : index
    %c0_40 = arith.constant 0 : index
    %120 = vector.load %arg8[%c0_39, %c0_40] : memref<16x32xf32, #tpu.memory_space<vmem>>, vector<16x32xf32>
    tpu.vector_store %arg8[%c0_39, %c0_40], %119 {strides = array<i32>} : memref<16x32xf32, #tpu.memory_space<vmem>>, vector<16x32xf32>,
    return
  }
  func.func @transform_0(%arg0: i32) -> (i32, i32) {
    %c0_i32 = arith.constant 0 : i32
    %c0_i32_0 = arith.constant 0 : i32
    return %arg0, %c0_i32 : i32, i32
  }
  func.func @transform_1(%arg0: i32) -> (i32, i32) {
    %c0_i32 = arith.constant 0 : i32
    %c0_i32_0 = arith.constant 0 : i32
    %c0_i32_1 = arith.constant 0 : i32
    return %c0_i32, %c0_i32_0 : i32, i32
  }
  func.func @transform_2(%arg0: i32) -> (i32, i32) {
    %c0_i32 = arith.constant 0 : i32
    %c0_i32_0 = arith.constant 0 : i32
    %c0_i32_1 = arith.constant 0 : i32
    return %c0_i32, %c0_i32_0 : i32, i32
  }
  func.func @transform_3(%arg0: i32) -> (i32, i32) {
    %c0_i32 = arith.constant 0 : i32
    %c0_i32_0 = arith.constant 0 : i32
    %c0_i32_1 = arith.constant 0 : i32
    return %c0_i32, %c0_i32_0 : i32, i32
  }
  func.func @transform_4(%arg0: i32) -> (i32, i32) {
    %c0_i32 = arith.constant 0 : i32
    %c0_i32_0 = arith.constant 0 : i32
    %c0_i32_1 = arith.constant 0 : i32
    return %c0_i32, %c0_i32_0 : i32, i32
  }
  func.func @transform_5(%arg0: i32) -> (i32, i32) {
    %c0_i32 = arith.constant 0 : i32
    %c0_i32_0 = arith.constant 0 : i32
    %c0_i32_1 = arith.constant 0 : i32
    return %c0_i32, %c0_i32_0 : i32, i32
  }
  func.func @transform_6(%arg0: i32) -> (i32, i32) {
    %c0_i32 = arith.constant 0 : i32
    %c0_i32_0 = arith.constant 0 : i32
    return %arg0, %c0_i32 : i32, i32
  }
  func.func @transform_7(%arg0: i32) -> (i32, i32) {
    %c0_i32 = arith.constant 0 : i32
    %c0_i32_0 = arith.constant 0 : i32
    return %arg0, %c0_i32 : i32, i32
  }
}

</mosaic_0001>

<bundles_post_ra>
// kernel: tpu_custom_call.1
= control target key start
LH: loop header
LB: loop body
LE: loop exit
PB: predicated region body
PF: predicated region fallthrough
CT: control target
= control target key end

     0   :  { %s1174_s24 = smov 0   ;;  %s1348_s0 = inlined_call_operand.vmem [shape: f32[64,8], index: 0, kind: input, shape index: {}]   ;;  %s1349_s1 = inlined_call_operand.vmem [shape: f32[64,8], index: 1, kind: input, shape index: {}]   ;;  %s1350_s2 = inlined_call_operand.vmem [shape: f32[8,64], index: 2, kind: input, shape index: {}]   ;;  %s1351_s3 = inlined_call_operand.vmem [shape: f32[8,32], index: 3, kind: input, shape index: {}]   ;;  %s1352_s4 = inlined_call_operand.vmem [shape: f32[8,4], index: 4, kind: input, shape index: {}]   ;;  %s1353_s5 = inlined_call_operand.vmem [shape: f32[4,8], index: 5, kind: input, shape index: {}]   ;;  %s1354_s6 = inlined_call_operand.vmem [shape: bf16[64,64], index: 6, kind: input, shape index: {}]   ;;  %s1355_s7 = inlined_call_operand.vmem [shape: f32[64,32], index: 7, kind: output, shape index: {}]  }
   0x1 LB: > { %s938_s25 = sadd.s32 4294967295, %s1122_s24   ;;  %p942_p0 = scmp.ge.s32.totalorder %s1122_s24, 1  ;;  %s1122_s24 = sphi %s1174_s24, %s17_s24  }
   0x2   : > { %p249_p1 = scmp.lt.s32.totalorder %s1122_s24, 5 }
   0x4   : > { %p250_p2 = pnand %p942_p0, %p249_p1 }
   0x5   : > { %s943_s30 = sshll.u32 (!%p250_p2), %s938_s25, 1  ;;  %s1127_s11 = smov (!%p250_p2), 104  }
   0x6   : > { %253 = sbr.rel (%p250_p2) target bundleno = 862 (0x35e), region = 48  ;;  %p287_p3 = scmp.lt.s32.totalorder (!%p250_p2), %s943_s30, 7 }
   0x7   : > { %s1128_s12 = smov (!%p250_p2), 112   ;;  %s1129_s13 = smov (!%p250_p2), 120  }
   0x8   : > { %s1131_s19 = smov (!%p250_p2), 8   ;;  %s1132_s20 = smov (!%p250_p2), 24  }
   0x9   : > { %s1133_s21 = smov (!%p250_p2), 16  }
   0xb   : > { %v315_v0 = vld [vmem:[%s1351_s3] sm:$0xff]  ;;  %v312_v1 = vld [vmem:[%s1349_s1 + $0x30] sm:$0xff]  ;;  %vm316_vm0 = vcmask 64512   ;;  %s1357_s30 = smov (!%p287_p3, %s943_s30), 7  ;;  %v313_v4 = vld [vmem:[%s1349_s1 + $0x38] sm:$0xff]  ;;  %v1124_v14 = vmov 2  }
   0xc   : > { %982 = vmatpush.msra.mxu1 %v315_v0  ;;  %v382_v2 = vld [vmem:[%s1352_s4] sm:$0xff]  ;;  %356 = vmatpush.msra.mxu0 %v315_v0  ;;  %v307_v5 = vld [vmem:[%s1349_s1 + $0x8] sm:$0xff]  ;;  %s944_s16 = sshll.u32 %s1357_s30, 3  ;;  %v308_v9 = vld [vmem:[%s1349_s1 + $0x10] sm:$0xff]  ;;  %v1125_v15 = vmov 1   ;;  %v1126_v16 = vmov 0  }
   0xd   : > { %v306_v3 = vld [vmem:[%s1349_s1] sm:$0xff]  ;;  %955 = vmatmul.msk.f32.vlgmr.msra.gmra.mxu1 %vm316_vm0, %v312_v1  ;;  %s290_s23 = scalar_lea.vmem %s1348_s0, %s944_s16  ;;  %v309_v11 = vld [vmem:[%s1349_s1 + $0x18] sm:$0xff]  ;;  %v311_v13 = vld [vmem:[%s1349_s1 + $0x28] sm:$0xff]  ;;  %1017 = vset.pattern.permute.xlu1 %v1124_v14  ;;  %v1130_v26 = vmov 3   ;;  %s946_s14 = sshll.u32 %s1357_s30, 2  ;;  %vm459_vm1 = vcmask 523264  }
   0xe   : > { %949 = vmatmul.msk.f32.vlgmr.msra.gmra.mxu0 %vm316_vm0, %v306_v3  ;;  %404 = vmatpush.msrb.mxu1 %v382_v2  ;;  %v314_v6 = vld [vmem:[%s1350_s2] sm:$0xff]  ;;  %v305_v10 = vld [vmem:[%s290_s23 + $0x8] sm:$0xff]  ;;  %s296_s18 = scalar_lea.vmem %s1354_s6, %s946_s14  ;;  %vm861_vm9 = vcmask 130048   ;;  %vm864_vm10 = vcmask 195584   ;;  %s302_s25 = scalar_lea.vmem %s1355_s7, %s944_s16  ;;  %vm867_vm11 = vcmask 261120  }
   0xf   : > { %v412_v7 = vld [vmem:[%s1353_s5] sm:$0xf]  ;;  %431 = vmatpush.msra.mxu2 %v314_v6  ;;  %1019 = vset.pattern.permute.xlu2 %v1125_v15 }
  0x10   : > { %959 = vmatmul.msk.f32.vlgmr.msra.gmra.mxu2 %vm316_vm0, %v412_v7  ;;  %v304_v8 = vld [vmem:[%s290_s23] sm:$0xff]  ;;  %1016 = vset.pattern.permute.xlu0 %v1126_v16 }
  0x11   : > { %v310_v12 = vld [vmem:[%s1349_s1 + $0x20] sm:$0xff] }
  0x12   : > { %v979_v45 = vld [vmem:[%s296_s18] sm:$0xff]  }
  0x13   : > { %v980_v50 = vunpack.c.l.bf16 %v979_v45 }
  0x15   : > { %956 = vmatmul.msk.f32.gmra.mxu1 %vm316_vm0, %v313_v4 }
  0x16   : > { %950 = vmatmul.msk.f32.gmra.mxu0 %vm316_vm0, %v307_v5 }
  0x1d   : > { %957 = vmatmul.msk.f32.vlgmr.msrb.gmra.mxu1 %vm316_vm0, %v304_v8 }
  0x1e   : > { %951 = vmatmul.msk.f32.gmra.mxu0 %vm316_vm0, %v308_v9 }
  0x25   : > { %958 = vmatmul.msk.f32.gmra.mxu1 %vm316_vm0, %v305_v10 }
  0x26   : > { %952 = vmatmul.msk.f32.gmra.mxu0 %vm316_vm0, %v309_v11 }
  0x2e   : > { %953 = vmatmul.msk.f32.gmra.mxu0 %vm316_vm0, %v310_v12 }
  0x36   : > { %954 = vmatmul.msk.f32.gmra.mxu0 %vm316_vm0, %v311_v13  ;;  %v981_v13 = vunpack.c.h.bf16 %v979_v45 }
  0x8a   : > { %v376_v17 = vpop.f32.mrf.mxu1 }
  0x8b   : > { %v358_v18 = vpop.f32.mrf.mxu0 }
  0x92   : > { %v379_v19 = vpop.f32.mrf.mxu1 }
  0x93   : > { %v361_v20 = vpop.f32.mrf.mxu0  ;;  %496 = vmatpush.msra.mxu3 %v379_v19  ;;  %v1006_v21 = vpack.i.bf16 %v376_v17, %v379_v19  ;;  %v1250_v38 = vpop.f32.mrf.mxu2 }
  0x94   : > { %v1240_v28 = vpack.i.bf16 %v358_v18, %v361_v20  ;;  %v639_v39 = vperm.slane %v1250_v38, 2  ;;  %v450_v49 = vperm.slane %v1250_v38, 0  ;;  %v741_v51 = vperm.slane %v1250_v38, 3 }
  0x95   : > { %1007 = vrot.lane.b32.xlu1 %v1006_v21, %s1127_s11  ;;  %1002 = vrot.lane.b32.xlu0 %v1006_v21, %s1128_s12  ;;  %v529_v60 = vperm.slane %v1250_v38, 1 }
  0x96   : > { %497 = vmatpush.msra.mxu3 %v376_v17 }
  0x9a   : > { %v406_v22 = vpop.f32.mrf.mxu1 }
  0x9b   : > { %v364_v23 = vpop.f32.mrf.mxu0  ;;  %522 = vperm.xlu2 %1019, %v406_v22  }
  0x9d   : > { %1012 = vrot.lane.b32.xlu0 %v1006_v21, %s1129_s13  ;;  %632 = vperm.xlu1 %1017, %v406_v22  }
  0xa2   : > { %v409_v25 = vpop.f32.mrf.mxu1 }
  0xa3   : > { %v367_v24 = vpop.f32.mrf.mxu0  ;;  %1020 = vset.pattern.permute.xlu2 %v1124_v14 }
  0xa4   : > { %636 = vperm.xlu2 %1020, %v409_v25   ;;  %v1243_v31 = vpack.i.bf16 %v364_v23, %v367_v24 }
  0xa5   : > { %1018 = vset.pattern.permute.xlu1 %v1130_v26  ;;  %442 = vperm.xlu0 %1016, %v406_v22  }
  0xa6   : > { %734 = vperm.xlu1 %1018, %v406_v22  }
  0xab   : > { %v370_v27 = vpop.f32.mrf.mxu0 }
  0xad   : > { %447 = vperm.xlu0 %1016, %v409_v25  }
  0xae   : > { %1022 = vset.pattern.permute.xlu1 %v1125_v15 }
  0xaf   : > { %526 = vperm.xlu1 %1022, %v409_v25  }
  0xb3   : > { %v373_v29 = vpop.f32.mrf.mxu0 }
  0xb4   : > { %v1028_v30 = vpack.i.bf16 %v370_v27, %v373_v29  ;;  %498 = vmatpush.msra.mxu3 %v373_v29 }
  0xb5   : > { %1021 = vset.pattern.permute.xlu0 %v1130_v26 }
  0xb6   : > { %499 = vmatpush.msra.mxu3 %v370_v27  ;;  %738 = vperm.xlu0 %1021, %v409_v25  }
  0xb7   : > { %1029 = vrot.lane.b32.xlu2 %v1028_v30, %s1128_s12 }
  0xb8   : > { %500 = vmatpush.msra.mxu3 %v367_v24 }
  0xba   : > { %501 = vmatpush.msra.mxu3 %v364_v23 }
  0xbc   : > { %502 = vmatpush.msra.mxu3 %v361_v20 }
  0xbe   : > { %503 = vmatpush.msra.mxu3 %v358_v18  ;;  %1024 = vrot.lane.b32.xlu0 %v1243_v31, %s1128_s12 }
  0xc6   : > { %1034 = vrot.lane.b32.xlu0 %v1028_v30, %s1127_s11 }
  0xce   : > { %1039 = vrot.lane.b32.xlu0 %v1028_v30, %s1129_s13 }
  0xf5   : > { %v523_v40 = vpop.permute.xlu2 %522 }
  0xf6   : > { %v530_v0 = vadd.f32 %v529_v60, %v523_v40 }
  0xf8   : > { %v532_v12 = vmul.f32 0.01, %v530_v0 }
  0xfa   : > { %v534_v20 = vmax.f32 %v530_v0, %v532_v12 }
  0xfc   : > { %v536_v30 = vadd.f32 %v980_v50, %v534_v20 }
  0xfe   : > { %v637_v53 = vpop.permute.xlu2 %636 }
  0xff   : > { %v641_v1 = vadd.f32 %v639_v39, %v637_v53 }
 0x101   : > { %v643_v14 = vmul.f32 0.01, %v641_v1 }
 0x103   : > { %v645_v21 = vmax.f32 %v641_v1, %v643_v14 }
 0x107   : > { %v1008_v32 = vpop.permute.xlu1 %1007  ;;  %v1003_v33 = vpop.permute.xlu0 %1002 }
 0x108   : > { %v1004_v34 = vunpack.i.l.bf16 %v1003_v33  ;;  %v1009_v35 = vunpack.i.l.bf16 %v1008_v32  ;;  %v1005_v36 = vunpack.i.h.bf16 %v1003_v33  ;;  %v1010_v37 = vunpack.i.h.bf16 %v1008_v32 }
 0x109   : > { %v1273_v32 = vadd.f32 %v981_v13, %v645_v21 }
 0x10a   : > { %708 = vmatpush.msrb.mxu2 %v1004_v34  ;;  %810 = vmatpush.msrb.mxu3 %v1009_v35  ;;  %v538_v34 = vsel %vm459_vm1, %v536_v30, -inf }
 0x10b   : > { %v651_v35 = vsel %vm459_vm1, %v1273_v32, -inf }
 0x10c   : > { %709 = vmatpush.msrb.mxu2 %v1005_v36  ;;  %811 = vmatpush.msrb.mxu3 %v1010_v37 }
 0x10f   : > { %v1013_v41 = vpop.permute.xlu0 %1012  ;;  %v633_v42 = vpop.permute.xlu1 %632 }
 0x110   : > { %v1014_v43 = vunpack.i.l.bf16 %v1013_v41  ;;  %v640_v44 = vadd.f32 %v639_v39, %v633_v42  ;;  %v1015_v46 = vunpack.i.h.bf16 %v1013_v41 }
 0x111   : > { %v1030_v4 = vpop.permute.xlu2 %1029 }
 0x112   : > { %v642_v47 = vmul.f32 0.01, %v640_v44  ;;  %606 = vmatpush.msra.mxu1 %v1014_v43  ;;  %v1031_v7 = vunpack.i.l.bf16 %v1030_v4  ;;  %v1032_v8 = vunpack.i.h.bf16 %v1030_v4 }
 0x114   : > { %v644_v48 = vmax.f32 %v640_v44, %v642_v47  ;;  %607 = vmatpush.msra.mxu1 %v1015_v46  ;;  %710 = vmatpush.msrb.mxu2 %v1031_v7 }
 0x116   : > { %v1258_v52 = vadd.f32 %v980_v50, %v644_v48  ;;  %711 = vmatpush.msrb.mxu2 %v1032_v8 }
 0x117   : > { %v443_v54 = vpop.permute.xlu0 %442 }
 0x118   : > { %v451_v55 = vadd.f32 %v450_v49, %v443_v54  ;;  %v735_v56 = vpop.permute.xlu1 %734  ;;  %v648_v57 = vsel %vm459_vm1, %v1258_v52, -inf }
 0x119   : > { %v742_v58 = vadd.f32 %v741_v51, %v735_v56  ;;  %649 = vmax.xlane.f32.xlu0 %v648_v57 }
 0x11a   : > { %v453_v59 = vmul.f32 0.01, %v451_v55 }
 0x11b   : > { %v744_v61 = vmul.f32 0.01, %v742_v58 }
 0x11c   : > { %v455_v62 = vmax.f32 %v451_v55, %v453_v59 }
 0x11d   : > { %v746_v2 = vmax.f32 %v742_v58, %v744_v61 }
 0x11e   : > { %v1263_v63 = vadd.f32 %v980_v50, %v455_v62 }
 0x11f   : > { %v448_v3 = vpop.permute.xlu0 %447  ;;  %v748_v17 = vadd.f32 %v980_v50, %v746_v2 }
 0x120   : > { %v452_v5 = vadd.f32 %v450_v49, %v448_v3  ;;  %v460_v6 = vsel %vm459_vm1, %v1263_v63, -inf }
 0x121   : > { %v527_v9 = vpop.permute.xlu1 %526  ;;  %461 = vmax.xlane.f32.xlu2 %v460_v6  ;;  %v750_v23 = vsel %vm459_vm1, %v748_v17, -inf }
 0x122   : > { %v454_v10 = vmul.f32 0.01, %v452_v5  ;;  %v531_v11 = vadd.f32 %v529_v60, %v527_v9 }
 0x124   : > { %v456_v15 = vmax.f32 %v452_v5, %v454_v10  ;;  %v533_v16 = vmul.f32 0.01, %v531_v11 }
 0x126   : > { %v535_v18 = vmax.f32 %v531_v11, %v533_v16  ;;  %v458_v19 = vadd.f32 %v981_v13, %v456_v15 }
 0x128   : > { %v739_v22 = vpop.permute.xlu0 %738  ;;  %v463_v24 = vsel %vm459_vm1, %v458_v19, -inf  ;;  %v1269_v25 = vadd.f32 %v981_v13, %v535_v18 }
 0x129   : > { %v743_v26 = vadd.f32 %v741_v51, %v739_v22  ;;  %751 = vmax.xlane.f32.xlu2 %v750_v23  ;;  %464 = vmax.xlane.f32.xlu1 %v463_v24 }
 0x12a   : > { %v541_v27 = vsel %vm459_vm1, %v1269_v25, -inf }
 0x12b   : > { %542 = vmax.xlane.f32.xlu0 %v541_v27  ;;  %v745_v29 = vmul.f32 0.01, %v743_v26 }
 0x12d   : > { %v747_v33 = vmax.f32 %v743_v26, %v745_v29 }
 0x12f   : > { %v749_v39 = vadd.f32 %v981_v13, %v747_v33 }
 0x130   : > { %v1025_v36 = vpop.permute.xlu0 %1024 }
 0x131   : > { %539 = vmax.xlane.f32.xlu2 %v538_v34  ;;  %652 = vmax.xlane.f32.xlu1 %v651_v35  ;;  %v1026_v37 = vunpack.i.l.bf16 %v1025_v36  ;;  %v1027_v38 = vunpack.i.h.bf16 %v1025_v36  ;;  %v753_v40 = vsel %vm459_vm1, %v749_v39, -inf }
 0x133   : > { %712 = vmatpush.msrb.mxu2 %v1026_v37 }
 0x135   : > { %713 = vmatpush.msrb.mxu2 %v1027_v38 }
 0x138   : > { %v1035_v41 = vpop.permute.xlu0 %1034 }
 0x139   : > { %754 = vmax.xlane.f32.xlu2 %v753_v40  ;;  %v1036_v42 = vunpack.i.l.bf16 %v1035_v41  ;;  %v1037_v43 = vunpack.i.h.bf16 %v1035_v41 }
 0x13b   : > { %812 = vmatpush.msrb.mxu3 %v1036_v42 }
 0x13d   : > { %813 = vmatpush.msrb.mxu3 %v1037_v43 }
 0x13f   : > { %1044 = vrot.lane.b32.xlu0 %v1243_v31, %s1127_s11 }
 0x140   : > { %v1040_v44 = vpop.permute.xlu0 %1039 }
 0x141   : > { %v1042_v45 = vunpack.i.h.bf16 %v1040_v44  ;;  %v1041_v46 = vunpack.i.l.bf16 %v1040_v44 }
 0x143   : > { %608 = vmatpush.msra.mxu1 %v1041_v46 }
 0x145   : > { %609 = vmatpush.msra.mxu1 %v1042_v45 }
 0x151   : > { %1054 = vrot.lane.b32.xlu2 %v1243_v31, %s1129_s13 }
 0x18c   : > { %v650_v58 = vpop.xlane.xlu0 %649 }
 0x18d   : > { %v654_v20 = vsub.f32 %v1258_v52, %v650_v58 }
 0x18f   : > { %v656_v21 = vmul.f32 1.442695, %v654_v20 }
 0x194   : > { %v462_v47 = vpop.xlane.xlu2 %461 }
 0x195   : > { %v466_v48 = vsub.f32 %v1263_v63, %v462_v47 }
 0x197   : > { %v468_v49 = vmul.f32 1.442695, %v466_v48 }
 0x199   : > { %1068 = vpow2.f32 %v468_v49 }
 0x19c   : > { %v752_v50 = vpop.xlane.xlu2 %751  ;;  %v465_v51 = vpop.xlane.xlu1 %464 }
 0x19d   : > { %v756_v53 = vsub.f32 %v748_v17, %v752_v50  ;;  %v467_v56 = vsub.f32 %v458_v19, %v465_v51 }
 0x19e   : > { %v543_v0 = vpop.xlane.xlu0 %542 }
 0x19f   : > { %v1284_v54 = vpop.eup %1068  ;;  %v758_v55 = vmul.f32 1.442695, %v756_v53  ;;  %v470_v59 = vmul.f32 1.442695, %v467_v56  ;;  %v545_v5 = vsub.f32 %v1269_v25, %v543_v0 }
 0x1a0   : > { %v472_v57 = vsel %vm459_vm1, %v1284_v54, 0.0 }
 0x1a1   : > { %1070 = vpow2.f32 %v758_v55  ;;  %473 = vadd.xlane.f32.xlu1 %v472_v57  ;;  %v548_v11 = vmul.f32 1.442695, %v545_v5 }
 0x1a2   : > { %1072 = vpow2.f32 %v470_v59 }
 0x1a4   : > { %v540_v31 = vpop.xlane.xlu2 %539  ;;  %v653_v22 = vpop.xlane.xlu1 %652 }
 0x1a5   : > { %v544_v60 = vsub.f32 %v536_v30, %v540_v31  ;;  %v655_v23 = vsub.f32 %v1273_v32, %v653_v22 }
 0x1a7   : > { %v1288_v61 = vpop.eup %1070  ;;  %v546_v62 = vmul.f32 1.442695, %v544_v60  ;;  %v658_v24 = vmul.f32 1.442695, %v655_v23 }
 0x1a8   : > { %v762_v63 = vsel %vm459_vm1, %v1288_v61, 0.0  ;;  %v1073_v2 = vpop.eup %1072 }
 0x1a9   : > { %1074 = vpow2.f32 %v546_v62  ;;  %763 = vadd.xlane.f32.xlu2 %v762_v63  ;;  %v475_v8 = vsel %vm459_vm1, %v1073_v2, 0.0 }
 0x1ac   : > { %v755_v1 = vpop.xlane.xlu2 %754 }
 0x1ad   : > { %v757_v3 = vsub.f32 %v749_v39, %v755_v1 }
 0x1af   : > { %v1292_v4 = vpop.eup %1074  ;;  %v760_v6 = vmul.f32 1.442695, %v757_v3 }
 0x1b0   : > { %v550_v7 = vsel %vm459_vm1, %v1292_v4, 0.0 }
 0x1b1   : > { %1076 = vpow2.f32 %v760_v6  ;;  %551 = vadd.xlane.f32.xlu0 %v550_v7  ;;  %476 = vadd.xlane.f32.xlu2 %v475_v8  ;;  %v1045_v9 = vpop.permute.xlu0 %1044 }
 0x1b2   : > { %v1046_v10 = vunpack.i.l.bf16 %v1045_v9  ;;  %v1047_v13 = vunpack.i.h.bf16 %v1045_v9  ;;  %1078 = vpow2.f32 %v548_v11 }
 0x1b3   : > { %1080 = vpow2.f32 %v656_v21 }
 0x1b4   : > { %v1055_v12 = vpop.permute.xlu2 %1054  ;;  %814 = vmatpush.msrb.mxu3 %v1046_v10  ;;  %1082 = vpow2.f32 %v658_v24 }
 0x1b5   : > { %v1056_v14 = vunpack.i.l.bf16 %v1055_v12  ;;  %v1057_v16 = vunpack.i.h.bf16 %v1055_v12 }
 0x1b6   : > { %815 = vmatpush.msrb.mxu3 %v1047_v13 }
 0x1b7   : > { %v1298_v15 = vpop.eup %1076  ;;  %610 = vmatpush.msra.mxu1 %v1056_v14 }
 0x1b8   : > { %v765_v17 = vsel %vm459_vm1, %v1298_v15, 0.0  ;;  %v1079_v18 = vpop.eup %1078 }
 0x1b9   : > { %766 = vadd.xlane.f32.xlu0 %v765_v17  ;;  %611 = vmatpush.msra.mxu1 %v1057_v16  ;;  %v553_v19 = vsel %vm459_vm1, %v1079_v18, 0.0  ;;  %v1081_v25 = vpop.eup %1080 }
 0x1ba   : > { %1049 = vrot.lane.b32.xlu1 %v1240_v28, %s1128_s12  ;;  %v660_v26 = vsel %vm459_vm1, %v1081_v25, 0.0  ;;  %v1083_v27 = vpop.eup %1082 }
 0x1bb   : > { %v663_v29 = vsel %vm459_vm1, %v1083_v27, 0.0 }
 0x1c1   : > { %554 = vadd.xlane.f32.xlu0 %v553_v19 }
 0x1c9   : > { %1059 = vrot.lane.b32.xlu2 %v1240_v28, %s1127_s11 }
 0x1d1   : > { %1064 = vrot.lane.b32.xlu2 %v1240_v28, %s1129_s13 }
 0x1e4   : > { %661 = vadd.xlane.f32.xlu1 %v660_v26 }
 0x1ec   : > { %664 = vadd.xlane.f32.xlu1 %v663_v29 }
 0x214   : > { %v474_v30 = vpop.xlane.xlu1 %473 }
 0x215   : > { %1084 = vrcp.f32 %v474_v30 }
 0x21b   : > { %v1085_v28 = vpop.eup %1084 }
 0x21c   : > { %v764_v33 = vpop.xlane.xlu2 %763  ;;  %v480_v52 = vmul.f32 %v1085_v28, %v1284_v54 }
 0x21e   : > { %960 = vmatmul.msk.f32.vlgmr.msra.gmra.mxu3 %vm459_vm1, %v480_v52 }
 0x224   : > { %v477_v34 = vpop.xlane.xlu2 %476  ;;  %v552_v32 = vpop.xlane.xlu0 %551 }
 0x225   : > { %1086 = vrcp.f32 %v477_v34 }
 0x226   : > { %1088 = vrcp.f32 %v764_v33 }
 0x227   : > { %1090 = vrcp.f32 %v552_v32 }
 0x22b   : > { %v1087_v35 = vpop.eup %1086 }
 0x22c   : > { %v1050_v36 = vpop.permute.xlu1 %1049  ;;  %v1060_v37 = vpop.permute.xlu2 %1059  ;;  %v481_v38 = vmul.f32 %v1087_v35, %v1073_v2 }
 0x22d   : > { %v767_v39 = vpop.xlane.xlu0 %766  ;;  %v1051_v40 = vunpack.i.l.bf16 %v1050_v36  ;;  %v1061_v41 = vunpack.i.l.bf16 %v1060_v37  ;;  %v1052_v42 = vunpack.i.h.bf16 %v1050_v36  ;;  %v1062_v43 = vunpack.i.h.bf16 %v1060_v37  ;;  %v1089_v44 = vpop.eup %1088 }
 0x22e   : > { %961 = vmatmul.msk.f32.gmra.mxu3 %vm459_vm1, %v481_v38  ;;  %1092 = vrcp.f32 %v767_v39  ;;  %v770_v46 = vmul.f32 %v1089_v44, %v1288_v61  ;;  %v1091_v47 = vpop.eup %1090 }
 0x22f   : > { %714 = vmatpush.msrb.mxu2 %v1051_v40  ;;  %816 = vmatpush.msrb.mxu3 %v1061_v41  ;;  %v558_v51 = vmul.f32 %v1091_v47, %v1292_v4 }
 0x231   : > { %715 = vmatpush.msrb.mxu2 %v1052_v42  ;;  %817 = vmatpush.msrb.mxu3 %v1062_v43 }
 0x234   : > { %v1065_v45 = vpop.permute.xlu2 %1064  ;;  %v1093_v53 = vpop.eup %1092 }
 0x235   : > { %v1066_v48 = vunpack.i.l.bf16 %v1065_v45  ;;  %v555_v49 = vpop.xlane.xlu0 %554  ;;  %v1067_v50 = vunpack.i.h.bf16 %v1065_v45  ;;  %v771_v54 = vmul.f32 %v1093_v53, %v1298_v15 }
 0x236   : > { %972 = vmatmul.msk.f32.vlgmr.msrb.gmra.mxu3 %vm459_vm1, %v770_v46  ;;  %1094 = vrcp.f32 %v555_v49 }
 0x237   : > { %612 = vmatpush.msra.mxu1 %v1066_v48 }
 0x239   : > { %613 = vmatpush.msra.mxu1 %v1067_v50 }
 0x23a   : > { %964 = vmatmul.msk.f32.vlgmr.msra.gmra.mxu1 %vm459_vm1, %v558_v51 }
 0x23c   : > { %v1095_v55 = vpop.eup %1094 }
 0x23d   : > { %v559_v56 = vmul.f32 %v1095_v55, %v1079_v18 }
 0x23e   : > { %973 = vmatmul.msk.f32.gmra.mxu3 %vm459_vm1, %v771_v54 }
 0x242   : > { %965 = vmatmul.msk.f32.gmra.mxu1 %vm459_vm1, %v559_v56 }
 0x257   : > { %v662_v57 = vpop.xlane.xlu1 %661 }
 0x258   : > { %1096 = vrcp.f32 %v662_v57 }
 0x25e   : > { %v1097_v58 = vpop.eup %1096 }
 0x25f   : > { %v665_v59 = vpop.xlane.xlu1 %664  ;;  %v668_v31 = vmul.f32 %v1097_v58, %v1081_v25 }
 0x260   : > { %1098 = vrcp.f32 %v665_v59 }
 0x261   : > { %968 = vmatmul.msk.f32.vlgmr.msrb.gmra.mxu2 %vm459_vm1, %v668_v31 }
 0x266   : > { %v1099_v60 = vpop.eup %1098 }
 0x267   : > { %v669_v61 = vmul.f32 %v1099_v60, %v1083_v27 }
 0x269   : > { %969 = vmatmul.msk.f32.gmra.mxu2 %vm459_vm1, %v669_v61 }
 0x2a1   : > { %v505_v62 = vpop.f32.mrf.mxu3 }
 0x2a2   : > { %v513_v28 = vmul.f32 1.442695, %v505_v62  ;;  %vm511_vm8 = vcmp.gt.f32.partialorder %v505_v62, 0.0 }
 0x2b1   : > { %v1325_v63 = vpop.f32.mrf.mxu3 }
 0x2b2   : > { %v515_v32 = vmul.f32 1.442695, %v1325_v63  ;;  %vm512_vm12 = vcmp.gt.f32.partialorder %v1325_v63, 0.0 }
 0x2b7   : > { %v615_v0 = vpop.f32.mrf.mxu1 }
 0x2b8   : > { %v623_v1 = vmul.f32 1.442695, %v615_v0  ;;  %vm621_vm2 = vcmp.gt.f32.partialorder %v615_v0, 0.0 }
 0x2b9   : > { %v819_v2 = vpop.f32.mrf.mxu3 }
 0x2ba   : > { %1100 = vpow2.f32 %v623_v1  ;;  %v827_v3 = vmul.f32 1.442695, %v819_v2  ;;  %vm825_vm3 = vcmp.gt.f32.partialorder %v819_v2, 0.0 }
 0x2bc   : > { %1102 = vpow2.f32 %v827_v3 }
 0x2bf   : > { %v618_v4 = vpop.f32.mrf.mxu1 }
 0x2c0   : > { %v1101_v5 = vpop.eup %1100  ;;  %v625_v6 = vmul.f32 1.442695, %v618_v4  ;;  %vm622_vm4 = vcmp.gt.f32.partialorder %v618_v4, 0.0 }
 0x2c1   : > { %v966_v7 = vadd.f32 -1.0, %v1101_v5  ;;  %v822_v17 = vpop.f32.mrf.mxu3 }
 0x2c2   : > { %v1103_v8 = vpop.eup %1102  ;;  %1104 = vpow2.f32 %v625_v6  ;;  %v829_v22 = vmul.f32 1.442695, %v822_v17  ;;  %vm826_vm7 = vcmp.gt.f32.partialorder %v822_v17, 0.0 }
 0x2c3   : > { %v974_v9 = vadd.f32 -1.0, %v1103_v8  ;;  %v629_v10 = vsel %vm621_vm2, %v615_v0, %v966_v7 }
 0x2c4   : > { %837 = vrot.lane.b32.xlu2 %v629_v10, %s1131_s19 }
 0x2c5   : > { %v833_v11 = vsel %vm825_vm3, %v819_v2, %v974_v9 }
 0x2c6   : > { %853 = vrot.lane.b32.xlu1 %v833_v11, %s1132_s20 }
 0x2c8   : > { %v1105_v12 = vpop.eup %1104 }
 0x2c9   : > { %v967_v13 = vadd.f32 -1.0, %v1105_v12 }
 0x2cb   : > { %v630_v14 = vsel %vm622_vm4, %v618_v4, %v967_v13 }
 0x2cc   : > { %839 = vrot.lane.b32.xlu0 %v630_v14, %s1131_s19 }
 0x2e4   : > { %v717_v15 = vpop.f32.mrf.mxu2 }
 0x2e5   : > { %v725_v16 = vmul.f32 1.442695, %v717_v15  ;;  %vm723_vm5 = vcmp.gt.f32.partialorder %v717_v15, 0.0 }
 0x2e7   : > { %1106 = vpow2.f32 %v725_v16 }
 0x2ec   : > { %v720_v18 = vpop.f32.mrf.mxu2 }
 0x2ed   : > { %v1107_v19 = vpop.eup %1106  ;;  %v727_v20 = vmul.f32 1.442695, %v720_v18  ;;  %vm724_vm6 = vcmp.gt.f32.partialorder %v720_v18, 0.0 }
 0x2ee   : > { %v970_v21 = vadd.f32 -1.0, %v1107_v19 }
 0x2ef   : > { %1108 = vpow2.f32 %v727_v20 }
 0x2f0   : > { %v731_v23 = vsel %vm723_vm5, %v717_v15, %v970_v21  ;;  %1110 = vpow2.f32 %v829_v22 }
 0x2f1   : > { %845 = vrot.lane.b32.xlu2 %v731_v23, %s1133_s21  ;;  %1112 = vpow2.f32 %v513_v28 }
 0x2f2   : > { %1114 = vpow2.f32 %v515_v32 }
 0x2f5   : > { %v1109_v24 = vpop.eup %1108 }
 0x2f6   : > { %v971_v25 = vadd.f32 -1.0, %v1109_v24  ;;  %v1111_v27 = vpop.eup %1110 }
 0x2f7   : > { %v975_v29 = vadd.f32 -1.0, %v1111_v27  ;;  %v1113_v33 = vpop.eup %1112 }
 0x2f8   : > { %v732_v26 = vsel %vm724_vm6, %v720_v18, %v971_v25  ;;  %v962_v34 = vadd.f32 -1.0, %v1113_v33  ;;  %v1115_v41 = vpop.eup %1114 }
 0x2f9   : > { %847 = vrot.lane.b32.xlu2 %v732_v26, %s1133_s21  ;;  %v834_v30 = vsel %vm826_vm7, %v822_v17, %v975_v29  ;;  %v963_v43 = vadd.f32 -1.0, %v1115_v41 }
 0x2fa   : > { %v519_v35 = vsel %vm511_vm8, %v505_v62, %v962_v34 }
 0x2fb   : > { %v520_v45 = vsel %vm512_vm12, %v1325_v63, %v963_v43 }
 0x301   : > { %855 = vrot.lane.b32.xlu2 %v834_v30, %s1132_s20 }
 0x31e   : > { %v838_v52 = vpop.permute.xlu2 %837 }
 0x31f   : > { %v859_v36 = vsel %vm316_vm0, %v519_v35, %v838_v52 }
 0x338   : > { %v854_v38 = vpop.permute.xlu1 %853 }
 0x33e   : > { %v840_v44 = vpop.permute.xlu0 %839 }
 0x33f   : > { %v860_v46 = vsel %vm316_vm0, %v520_v45, %v840_v44 }
 0x34b   : > { %v846_v37 = vpop.permute.xlu2 %845 }
 0x34c   : > { %v862_v39 = vsel %vm861_vm9, %v859_v36, %v846_v37 }
 0x34d   : > { %v865_v40 = vsel %vm864_vm10, %v862_v39, %v854_v38 }
 0x34e   : > { %868 = vst.msk [vmem:[%s302_s25] sm:$0xff] %vm867_vm11, %v865_v40 }
 0x353   : > { %v848_v42 = vpop.permute.xlu2 %847 }
 0x354   : > { %v863_v47 = vsel %vm861_vm9, %v860_v46, %v848_v42 }
 0x35b   : > { %v856_v48 = vpop.permute.xlu2 %855 }
 0x35c   : > { %v866_v49 = vsel %vm864_vm10, %v863_v47, %v856_v48 }
 0x35d   : > { %869 = vst.msk [vmem:[%s302_s25 + $0x8] sm:$0xff] %vm867_vm11, %v866_v49 }
 0x35e PF: > { %s17_s24 = sadd.s32 1, %s1122_s24  }
 0x35f   : > { %p14_p4 = scmp.ge.s32.totalorder %s17_s24, 6  }
 0x361   :  { %16 = sbr.rel (!%p14_p4) target bundleno = 1 (0x1), region = 81 }

</bundles_post_ra>
